<compile_context>
chip_gen: v7x
topology: tpu7x:2x2x1
jax: 0.10.0
libtpu: 0.0.40
codegen_flags: <defaults>
</compile_context>

<pallas_src>
import functools

import jax
import jax.numpy as jnp
from jax.experimental import pallas as pl
from jax.experimental.pallas import tpu as pltpu

_LANE = 128
_SUBLANE = 8


def _round_up(x, m):
    return ((x + m - 1) // m) * m


def _entropy_prob_kernel(x_ref, o_ref, acc_ref, *, eps, total_rows, tile_rows,
                         width, needs_mask, num_slices, steps):
    # acc += sum over tile of clamp(x, eps) * log(clamp(x, eps))
    j = pl.program_id(1)

    @pl.when(j == 0)
    def _():
        acc_ref[...] = jnp.zeros_like(acc_ref)

    x = x_ref[...].astype(jnp.float32)
    xc = jnp.maximum(x, eps)
    b = xc * jnp.log(xc)                              # (tb, W); log on EUP

    def _accumulate(vals):
        # Fold rows into the (8, W) accumulator with pure VPU adds; the one
        # cross-lane/sublane XLU reduce happens only at the final step.
        acc_ref[...] += vals.reshape(tile_rows // _SUBLANE, _SUBLANE, width).sum(axis=0)

    if needs_mask:
        # Only the globally-last tile can be partial; gate the iota + select so
        # it is skipped at runtime on every other grid step.
        is_last = jnp.logical_and(pl.program_id(0) == num_slices - 1,
                                  j == steps - 1)
        mask_start = (num_slices * steps - 1) * tile_rows

        @pl.when(is_last)
        def _():
            row_idx = (jax.lax.broadcasted_iota(jnp.int32, (tile_rows, 1), 0)
                       + mask_start)
            _accumulate(jnp.where(row_idx < total_rows, b, 0.0))

        @pl.when(jnp.logical_not(is_last))
        def _():
            _accumulate(b)
    else:
        _accumulate(b)

    @pl.when(j == steps - 1)
    def _():
        o_ref[...] = jnp.sum(acc_ref[...], keepdims=True)


def _entropy_logits_kernel(x_ref, o_ref, acc_ref, *, total_rows, tile_rows,
                           needs_mask, num_slices, steps):
    # per row: sum_c p*logp = sum_c(e*s)/z - log(z)   with s = x - max, e = exp(s)
    j = pl.program_id(1)

    @pl.when(j == 0)
    def _():
        acc_ref[...] = jnp.zeros_like(acc_ref)

    x = x_ref[...].astype(jnp.float32)
    m = jnp.max(x, axis=1, keepdims=True)
    s = x - m
    e = jnp.exp(s)                                    # EUP
    z = jnp.sum(e, axis=1, keepdims=True)             # (tb, 1)
    se = jnp.sum(e * s, axis=1, keepdims=True)        # (tb, 1)
    row = se / z - jnp.log(z)                         # (tb, 1) -- exact 1/z on tiny vector

    def _accumulate(vals):
        acc_ref[...] += vals.reshape(tile_rows // _SUBLANE, _SUBLANE, 1).sum(axis=0)

    if needs_mask:
        is_last = jnp.logical_and(pl.program_id(0) == num_slices - 1,
                                  j == steps - 1)
        mask_start = (num_slices * steps - 1) * tile_rows

        @pl.when(is_last)
        def _():
            row_idx = (jax.lax.broadcasted_iota(jnp.int32, (tile_rows, 1), 0)
                       + mask_start)
            _accumulate(jnp.where(row_idx < total_rows, row, 0.0))

        @pl.when(jnp.logical_not(is_last))
        def _():
            _accumulate(row)
    else:
        _accumulate(row)

    @pl.when(j == steps - 1)
    def _():
        o_ref[...] = jnp.sum(acc_ref[...], keepdims=True)


def _choose_tile_rows(n_rows, width, itemsize):
    # Budget ~8 MiB per input buffer (x2 for double buffering) using the
    # lane-padded width (a (TB, 32) f32 tile really occupies TB*128*4 in VMEM).
    wpad = _round_up(width, _LANE)
    per_buffer_target = 8 << 20
    rows = per_buffer_target // max(1, wpad * itemsize)
    rows = max(_SUBLANE, (rows // _SUBLANE) * _SUBLANE)
    if n_rows <= rows:
        rows = _round_up(n_rows, _SUBLANE)   # single sublane-aligned tile
    return rows


def entropy(x, input_as_probabilities: bool, small_number: float = 1e-8,
            *, tile_rows: int | None = None):
    """Pallas implementation of Entropy.forward(x, input_as_probabilities)."""
    if x.ndim == 1:
        x2 = x.reshape(1, -1)        # mean over 1 row == plain sum -> matches 1-D branch
    elif x.ndim == 2:
        x2 = x
    else:
        raise ValueError("Input tensor is %d-Dimensional" % x.ndim)

    B, C = x2.shape
    denom = B                        # mean over the *original* rows

    if input_as_probabilities and (C % _LANE != 0):
        # Lane-dense layout: the prob branch has no per-row structure, so flatten
        # to a width-128 slab. Tail is padded with 1.0 (clamp(1)*log(1) == 0).
        n = B * C
        npad = _round_up(n, _LANE)
        flat = x2.reshape(-1)
        if npad != n:
            flat = jnp.pad(flat, (0, npad - n),
                           constant_values=jnp.asarray(1.0, x2.dtype))
        x2 = flat.reshape(npad // _LANE, _LANE)

    n_rows, width = x2.shape
    itemsize = jnp.dtype(x2.dtype).itemsize

    tb = tile_rows if tile_rows is not None else _choose_tile_rows(n_rows, width, itemsize)
    tb = max(_SUBLANE, _round_up(tb, _SUBLANE))

    n_tiles = pl.cdiv(n_rows, tb)
    needs_mask = (n_rows % tb) != 0
    # Split tiles across the two TensorCores (v7x) when evenly possible.
    num_slices = 2 if (n_tiles >= 2 and n_tiles % 2 == 0) else 1
    steps = n_tiles // num_slices

    if input_as_probabilities:
        kernel = functools.partial(
            _entropy_prob_kernel, eps=float(small_number),
            total_rows=n_rows, tile_rows=tb, width=width,
            needs_mask=needs_mask, num_slices=num_slices, steps=steps)
        acc_scratch = pltpu.VMEM((_SUBLANE, width), jnp.float32)
        flops = 3 * n_rows * width
        transcendentals = n_rows * width            # one log per element
    else:
        kernel = functools.partial(
            _entropy_logits_kernel,
            total_rows=n_rows, tile_rows=tb,
            needs_mask=needs_mask, num_slices=num_slices, steps=steps)
        acc_scratch = pltpu.VMEM((_SUBLANE, 1), jnp.float32)
        flops = 5 * n_rows * width
        transcendentals = n_rows * width + 2 * n_rows   # exp/elem + log,div per row

    wpad = _round_up(width, _LANE)
    tile_bytes = tb * wpad * itemsize
    vmem_limit = min(max(32 << 20, 2 * tile_bytes + (4 << 20)), 128 << 20)

    partials = pl.pallas_call(
        kernel,
        out_shape=jax.ShapeDtypeStruct((num_slices, 1), jnp.float32),
        grid=(num_slices, steps),
        in_specs=[pl.BlockSpec((tb, width), lambda p, j: (p * steps + j, 0))],
        out_specs=pl.BlockSpec((1, 1), lambda p, j: (p, 0)),   # resident per-slice acc
        scratch_shapes=[acc_scratch],
        compiler_params=pltpu.CompilerParams(
            dimension_semantics=("parallel", "arbitrary"),
            vmem_limit_bytes=int(vmem_limit)),
        cost_estimate=pl.CostEstimate(
            flops=int(flops),
            transcendentals=int(transcendentals),
            bytes_accessed=int(n_rows * width * itemsize + num_slices * 4)),
    )(x2)

    return -jnp.sum(partials) / jnp.float32(denom)


def _entropy_ref(x, input_as_probabilities, small_number=1e-8):
    # pure-JAX reference for sanity checking
    if input_as_probabilities:
        xc = jnp.maximum(x.astype(jnp.float32), small_number)
        b = xc * jnp.log(xc)
    else:
        b = jax.nn.softmax(x, axis=1) * jax.nn.log_softmax(x, axis=1)
    if b.ndim == 2:
        return -jnp.mean(jnp.sum(b, axis=1))
    return -jnp.sum(b)


def _check(got, want, name):
    got = jax.block_until_ready(got)
    assert jnp.allclose(got, want, atol=1e-5, rtol=1e-5), (name, got, want)


if __name__ == "__main__":
    key = jax.random.PRNGKey(0)
    k1, k2, k3, k4 = jax.random.split(key, 4)
    eps = 1e-8

    # 1) logits input (softmax branch), single tile
    logits = jax.random.normal(k1, (8, 32), dtype=jnp.float32)
    _check(entropy(logits, False, eps), _entropy_ref(logits, False, eps), "logits-single")

    # 2) probability input (lane-dense reshape: 8*32 -> (2,128))
    probs = jax.nn.softmax(jax.random.normal(k2, (8, 32), dtype=jnp.float32), axis=1)
    _check(entropy(probs, True, eps), _entropy_ref(probs, True, eps), "probs-single")

    # 3) logits, multi-tile with partial last tile, odd tile count (1 slice)
    logits2 = jax.random.normal(k3, (20, 48), dtype=jnp.float32)
    _check(entropy(logits2, False, eps, tile_rows=8),
           _entropy_ref(logits2, False, eps), "logits-3tiles-mask")

    # 4) logits, even tile count -> 2 parallel slices, no mask
    logits3 = jax.random.normal(k4, (32, 48), dtype=jnp.float32)
    _check(entropy(logits3, False, eps, tile_rows=8),
           _entropy_ref(logits3, False, eps), "logits-2slices")

    # 5) logits, 2 parallel slices with a partial last tile
    logits4 = jax.random.normal(k1, (28, 48), dtype=jnp.float32)
    _check(entropy(logits4, False, eps, tile_rows=8),
           _entropy_ref(logits4, False, eps), "logits-2slices-mask")

    # 6) probs, lane-dense multi-row with partial tile (20*32=640 -> (5,128))
    probs2 = jax.nn.softmax(logits2[:, :32], axis=1)
    _check(entropy(probs2, True, eps, tile_rows=8),
           _entropy_ref(probs2, True, eps), "probs-lanedense-mask")

    # 7) probs, 2 parallel slices (64*32 -> (16,128), tb=8 -> 2x1 grid)
    probs3 = jax.nn.softmax(jax.random.normal(k2, (64, 32), dtype=jnp.float32), axis=1)
    _check(entropy(probs3, True, eps, tile_rows=8),
           _entropy_ref(probs3, True, eps), "probs-2slices")

    # 8) probs, padded flat tail (3*10=30 -> pad with 1.0 to 128)
    probs4 = jax.nn.softmax(jax.random.normal(k3, (3, 10), dtype=jnp.float32), axis=1)
    _check(entropy(probs4, True, eps), _entropy_ref(probs4, True, eps), "probs-pad")

    # 9) 1-D input (PyTorch 1-D branch: -b.sum())
    probs_1d = jax.nn.softmax(jax.random.normal(k2, (32,), dtype=jnp.float32))
    _check(entropy(probs_1d, True, eps), _entropy_ref(probs_1d, True, eps), "probs-1d")

    # 10) bf16 input (native-dtype DMA, f32 accumulation)
    logits_bf16 = jax.random.normal(k4, (24, 64), dtype=jnp.bfloat16)
    _check(entropy(logits_bf16, False, eps, tile_rows=8),
           _entropy_ref(logits_bf16.astype(jnp.float32), False, eps), "logits-bf16")

    print("KERNEL_OK")
</pallas_src>

<mosaic_0001>
module attributes {stable_mosaic.version = 11 : i64} {
  func.func @_entropy_logits_kernel(%arg0: i32, %arg1: i32, %arg2: memref<8x32xf32, #tpu.memory_space<vmem>>, %arg3: memref<1x1xf32, #tpu.memory_space<vmem>>, %arg4: memref<8x1xf32, #tpu.memory_space<vmem>>) attributes {dimension_semantics = [#tpu.dimension_semantics<parallel>, #tpu.dimension_semantics<arbitrary>], iteration_bounds = array<i64: 1, 1>, scalar_prefetch = 0 : i64, scratch_operands = 1 : i64, tpu.core_type = #tpu.core_type<tc>, window_params = [{transform_indices = @transform_0, window_bounds = array<i64: 8, 32>}, {transform_indices = @transform_1, window_bounds = array<i64: 1, 1>}]} {
    %c0_i32 = arith.constant 0 : i32
    %0 = arith.cmpi eq, %arg1, %c0_i32 : i32
    %1 = arith.extui %0 : i1 to i32
    %c0_i32_0 = arith.constant 0 : i32
    %2 = arith.cmpi ne, %1, %c0_i32_0 : i32
    scf.if %2 {
      %cst_11 = arith.constant 0.000000e+00 : f32
      %25 = vector.broadcast %cst_11 : f32 to vector<8x1xf32>
      %c0_12 = arith.constant 0 : index
      %c0_13 = arith.constant 0 : index
      %26 = vector.load %arg4[%c0_12, %c0_13] : memref<8x1xf32, #tpu.memory_space<vmem>>, vector<8x1xf32>
      tpu.vector_store %arg4[%c0_12, %c0_13], %25 {strides = array<i32>} : memref<8x1xf32, #tpu.memory_space<vmem>>, vector<8x1xf32>,
    } else {
    }
    %c0 = arith.constant 0 : index
    %c0_1 = arith.constant 0 : index
    %3 = vector.load %arg2[%c0, %c0_1] : memref<8x32xf32, #tpu.memory_space<vmem>>, vector<8x32xf32>
    %cst = arith.constant dense<0xFF800000> : vector<8xf32>
    %4 = vector.multi_reduction <maximumf>, %3, %cst [1] : vector<8x32xf32> to vector<8xf32>
    %5 = vector.shape_cast %4 : vector<8xf32> to vector<8x1xf32>
    %6 = vector.broadcast %5 : vector<8x1xf32> to vector<8x32xf32>
    %7 = arith.subf %3, %6 : vector<8x32xf32>
    %8 = math.exp %7 : vector<8x32xf32>
    %cst_2 = arith.constant dense<0.000000e+00> : vector<8xf32>
    %9 = vector.multi_reduction <add>, %8, %cst_2 [1] : vector<8x32xf32> to vector<8xf32>
    %10 = vector.shape_cast %9 : vector<8xf32> to vector<8x1xf32>
    %11 = arith.mulf %8, %7 : vector<8x32xf32>
    %cst_3 = arith.constant dense<0.000000e+00> : vector<8xf32>
    %12 = vector.multi_reduction <add>, %11, %cst_3 [1] : vector<8x32xf32> to vector<8xf32>
    %13 = vector.shape_cast %12 : vector<8xf32> to vector<8x1xf32>
    %14 = arith.divf %13, %10 : vector<8x1xf32>
    %15 = math.log %10 : vector<8x1xf32>
    %16 = arith.subf %14, %15 : vector<8x1xf32>
    %c0_4 = arith.constant 0 : index
    %c0_5 = arith.constant 0 : index
    %17 = vector.load %arg4[%c0_4, %c0_5] : memref<8x1xf32, #tpu.memory_space<vmem>>, vector<8x1xf32>
    %18 = vector.shape_cast %16 : vector<8x1xf32> to vector<1x8x1xf32>
    %cst_6 = arith.constant dense<0.000000e+00> : vector<8x1xf32>
    %19 = vector.multi_reduction <add>, %18, %cst_6 [0] : vector<1x8x1xf32> to vector<8x1xf32>
    %20 = arith.addf %17, %19 : vector<8x1xf32>
    %c0_7 = arith.constant 0 : index
    %c0_8 = arith.constant 0 : index
    %21 = vector.load %arg4[%c0_7, %c0_8] : memref<8x1xf32, #tpu.memory_space<vmem>>, vector<8x1xf32>
    tpu.vector_store %arg4[%c0_7, %c0_8], %20 {strides = array<i32>} : memref<8x1xf32, #tpu.memory_space<vmem>>, vector<8x1xf32>,
    %c0_i32_9 = arith.constant 0 : i32
    %22 = arith.cmpi eq, %arg1, %c0_i32_9 : i32
    %23 = arith.extui %22 : i1 to i32
    %c0_i32_10 = arith.constant 0 : i32
    %24 = arith.cmpi ne, %23, %c0_i32_10 : i32
    scf.if %24 {
      %c0_11 = arith.constant 0 : index
      %c0_12 = arith.constant 0 : index
      %25 = vector.load %arg4[%c0_11, %c0_12] : memref<8x1xf32, #tpu.memory_space<vmem>>, vector<8x1xf32>
      %26 = vector.shape_cast %25 : vector<8x1xf32> to vector<1x8x1xf32>
      %cst_13 = arith.constant dense<0.000000e+00> : vector<1xf32>
      %27 = vector.multi_reduction <add>, %26, %cst_13 [1, 2] : vector<1x8x1xf32> to vector<1xf32>
      %28 = vector.shape_cast %27 : vector<1xf32> to vector<1x1x1xf32>
      %29 = vector.extract %28[0, 0, 0] : f32 from vector<1x1x1xf32>
      %30 = vector.broadcast %29 : f32 to vector<1x1xf32>
      %c0_14 = arith.constant 0 : index
      %c0_15 = arith.constant 0 : index
      %31 = vector.load %arg3[%c0_14, %c0_15] : memref<1x1xf32, #tpu.memory_space<vmem>>, vector<1x1xf32>
      tpu.vector_store %arg3[%c0_14, %c0_15], %30 {strides = array<i32>} : memref<1x1xf32, #tpu.memory_space<vmem>>, vector<1x1xf32>,
    } else {
    }
    return
  }
  func.func @transform_0(%arg0: i32, %arg1: i32) -> (i32, i32) {
    %c1_i32 = arith.constant 1 : i32
    %0 = arith.muli %arg0, %c1_i32 : i32
    %1 = arith.addi %0, %arg1 : i32
    %c0_i32 = arith.constant 0 : i32
    %c0_i32_0 = arith.constant 0 : i32
    return %1, %c0_i32 : i32, i32
  }
  func.func @transform_1(%arg0: i32, %arg1: i32) -> (i32, i32) {
    %c0_i32 = arith.constant 0 : i32
    %c0_i32_0 = arith.constant 0 : i32
    return %arg0, %c0_i32 : i32, i32
  }
}

</mosaic_0001>

<bundles_post_ra>
// kernel: tpu_custom_call.1
= control target key start
LH: loop header
LB: loop body
LE: loop exit
PB: predicated region body
PF: predicated region fallthrough
CT: control target
= control target key end

     0   :  { %6 = vsyncpa [#allocation4], 0  ;;  %s187_s0 = inlined_call_operand.hbm [shape: f32[8,32], index: 0, kind: input, shape index: {}]   ;;  %s188_s1 = inlined_call_operand.hbm [shape: f32[1,1], index: 1, kind: output, shape index: {}]  }
   0x1   :  { %7 = vsyncpa [#allocation5], 0  ;;  %s147_s6 = smov [#allocation3]   ;;  %s99_s10 = scalar_lea.hbm %s187_s0, 128 }
   0x2   :  { %s17_s7 = sshll.u32 %s147_s6, 4  ;;  %p100_p0 = scmp.ne.s32.totalorder %s187_s0, %s99_s10  ;;  %s18_s7 = int_to_ptr.vmem [resolvable:$true] %s17_s7 }
   0x3   :  { %p103_p1 = scmp.lt.u32.totalorder %s99_s10, %s187_s0 }
   0x5   :  { %p105_p2 = pnand %p103_p1, %p100_p0 }
   0x7   :  { %108 = shalt.err (!%p105_p2)
}
   0x8   :  { %s109_s15 = scalar_lea.vmem %s18_s7, 128  ;;  %p114_p4 = scmp.lt.s32.totalorder %s18_s7, %s18_s7 }
   0x9   :  { %p110_p3 = scmp.ne.s32.totalorder %s18_s7, %s109_s15  ;;  %p115_p5 = scmp.lt.s32.totalorder %s109_s15, %s109_s15 }
   0xb   :  { %p116_p6 = por %p115_p5, %p114_p4 }
   0xd   :  { %p117_p7 = pnand %p116_p6, %p110_p3 }
   0xf   :  { %120 = shalt.err (!%p117_p7)
}
  0x10   :  { %20 = dma.hbm_to_vmem [thread:$0]  %s187_s0, 128, %s18_s7, [#allocation4]  }
  0x11   :  { %143 = dma.done.wait [#allocation4], 128  }
  0x12   :  { %144 = vsyncadd [#allocation4], 4294967168  ;;  %vm32_vm0 = vcmask 261120   ;;  %v31_v0 = vld [vmem:[#allocation3] sm:$0xff]  ;;  %vm29_vm1 = vcmask 7168   ;;  %v148_v9 = vmov 0.0  }
  0x13   :  { %v33_v1 = vsel %vm32_vm0, %v31_v0, -inf  ;;  %30 = vst.msk [vmem:[#allocation2] sm:$0xff] %vm29_vm1, %v148_v9  ;;  %s149_s0 = smov [#allocation6]   ;;  %vm71_vm2 = vcmask 0  }
  0x14   :  { %34 = vmax.xlane.f32.xlu0 %v33_v1  ;;  %s79_s18 = sshll.u32 %s149_s0, 4  ;;  %s80_s18 = int_to_ptr.vmem [resolvable:$true] %s79_s18 }
  0x15   :  { %s121_s20 = scalar_lea.vmem %s80_s18, 16  ;;  %s125_s21 = scalar_lea.vmem %s80_s18, 32 }
  0x16   :  { %p122_p8 = scmp.ne.s32.totalorder %s80_s18, %s121_s20  ;;  %p126_p9 = scmp.lt.s32.totalorder %s80_s18, %s80_s18 }
  0x17   :  { %p127_p10 = scmp.lt.s32.totalorder %s125_s21, %s121_s20 }
  0x19   :  { %p128_p11 = por %p127_p10, %p126_p9 }
  0x1a   :  { %v51_v16 = vld [vmem:[#allocation2] sm:$0xff] }
  0x1b   :  { %p129_p12 = pnand %p128_p11, %p122_p8 }
  0xa1   :  { %v35_v2 = vpop.xlane.xlu0 %34 }
  0xa2   :  { %v36_v3 = vsub.f32 %v31_v0, %v35_v2 }
  0xa4   :  { %v37_v4 = vmul.f32 1.442695, %v36_v3 }
  0xa6   :  { %93 = vpow2.f32 %v37_v4 }
  0xb0   :  { %v94_v5 = vpop.eup %93 }
  0xb1   :  { %v39_v6 = vsel %vm32_vm0, %v94_v5, 0.0  ;;  %v42_v7 = vmul.f32 %v94_v5, %v36_v3 }
  0xb2   :  { %40 = vadd.xlane.f32.xlu0 %v39_v6 }
  0xb3   :  { %v43_v8 = vsel %vm32_vm0, %v42_v7, 0.0 }
  0xb4   :  { %44 = vadd.xlane.f32.xlu1 %v43_v8 }
 0x13f   :  { %v41_v10 = vpop.xlane.xlu0 %40 }
 0x140   :  { %95 = vrcp.f32 %v41_v10 }
 0x141   :  { %97 = vlog2.f32 %v41_v10  ;;  %v45_v12 = vpop.xlane.xlu1 %44 }
 0x14a   :  { %v96_v11 = vpop.eup %95 }
 0x14b   :  { %v98_v13 = vpop.eup %97  ;;  %v47_v14 = vmul.f32 %v96_v11, %v45_v12 }
 0x14c   :  { %v49_v15 = vmul.f32 0.6931472, %v98_v13 }
 0x14e   :  { %v50_v17 = vsub.f32 %v47_v14, %v49_v15 }
 0x150   :  { %v53_v18 = vadd.f32 %v51_v16, %v50_v17 }
 0x152   :  { %55 = vst.msk [vmem:[#allocation2] sm:$0xff] %vm29_vm1, %v53_v18 }
 0x159   :  { %v59_v19 = vld [vmem:[#allocation2] sm:$0xff] }
 0x15a   :  { %v60_v20 = vsel %vm29_vm1, %v59_v19, 0.0 }
 0x15b   :  { %61 = vadd.xlane.f32.xlu1 %v60_v20 }
 0x1e8   :  { %v62_v21 = vpop.xlane.xlu1 %61 }
 0x1e9   :  { %v63_v22 = vrot.slane %v62_v21, 4 }
 0x1eb   :  { %v64_v23 = vadd.f32 %v63_v22, %v62_v21 }
 0x1ed   :  { %v65_v24 = vrot.slane %v64_v23, 2 }
 0x1ef   :  { %v66_v25 = vadd.f32 %v65_v24, %v64_v23 }
 0x1f1   :  { %v67_v26 = vrot.slane %v66_v25, 1 }
 0x1f3   :  { %v68_v27 = vadd.f32 %v67_v26, %v66_v25 }
 0x1f5   :  { %88 = vpush %v68_v27 }
 0x226   :  { %s89_s19 = spop %88 }
 0x227   :  { %v70_v28 = vstv %s89_s19 }
 0x228   :  { %72 = vst.msk [vmem:[#allocation6] sm:$0x1] %vm71_vm2, %v70_v28 }
 0x229   :  { %132 = shalt.err (!%p129_p12)
}
 0x22a   :  { %s133_s24 = scalar_lea.hbm %s188_s1, 16 }
 0x22b   :  { %p134_p13 = scmp.ne.s32.totalorder %s188_s1, %s133_s24  ;;  %p137_p0 = scmp.lt.u32.totalorder %s133_s24, %s188_s1 }
 0x22d   :  { %p139_p1 = pnand %p137_p0, %p134_p13 }
 0x22f   :  { %142 = shalt.err (!%p139_p1)
}
 0x230   :  { %82 = dma.vmem_to_hbm [thread:$0]  %s80_s18, 16, %s188_s1, [#allocation5]  }
 0x231   :  { %145 = dma.done.wait [#allocation5], 16  }
 0x232   :  { %146 = vsyncadd [#allocation5], 4294967280 }
 0x233   :  { %86 = vsyncpa [#allocation4], 1 }
 0x234   :  { %87 = vsyncpa [#allocation5], 1 }

</bundles_post_ra>
